<compile_context>
chip_gen: v6e
topology: v6e:2x2x1
jax: 0.10.0
libtpu: 0.0.40
codegen_flags: <defaults>
</compile_context>

<pallas_src>
import functools

import jax
import jax.numpy as jnp
from jax import lax
from jax.experimental import pallas as pl
from jax.experimental.pallas import tpu as pltpu


# ---------------------------------------------------------------------------
# Pallas kernels
# ---------------------------------------------------------------------------
def gru_bidir_kernel(x_ref, wih_ref, whh_ref, bgi_ref, bhn_ref,
                     h_out_ref, h_scratch, gi_scratch):
    """Bidirectional GRU over a batch-fused, time-major sequence.

    Grid: (direction, time-chunk).  direction 0 = forward, 1 = backward
    (backward walks chunks and in-chunk steps in reverse time order).

    x_ref   : (Tc*BB, E)  bf16  time-major rows: row = t*BB + b (chunk view)
    wih_ref : (1, E, 3H)  bf16  packed input->hidden weights  [r|z|n]
    whh_ref : (1, H, 3H)  bf16  packed hidden->hidden weights [r|z|n]
    bgi_ref : (1, 1, 3H)  f32   [b_ir+b_hr | b_iz+b_hz | b_in] (pre-folded)
    bhn_ref : (1, 1, H)   f32   b_hn (kept separate: n = tanh(gi_n + r*(gh_n+b_hn)))
    h_out   : (1, BB, H)  f32   final hidden state of this direction
    h_scratch : (BB, H)   f32   hidden-state carry across time chunks
    gi_scratch: (Tc*BB, 3H) f32 hoisted input projection for this chunk
    """
    d = pl.program_id(0)              # direction
    c = pl.program_id(1)              # time chunk
    nchunks = pl.num_programs(1)

    rows, _ = x_ref.shape             # rows = Tc * BB
    BB, H = h_scratch.shape
    Tc = rows // BB

    @pl.when(c == 0)
    def _():
        h_scratch[...] = jnp.zeros_like(h_scratch)

    # Hoisted input projection: one MXU-dense (Tc*BB, E) @ (E, 3H) matmul for
    # the whole chunk, with the r/z (pre-folded) and n input biases added once.
    gi_scratch[...] = (
        jnp.dot(x_ref[...], wih_ref[0], preferred_element_type=jnp.float32)
        + bgi_ref[0])

    whh = whh_ref[0]                  # (H, 3H) bf16
    b_hn = bhn_ref[0]                 # (1, H)  f32

    # Backward direction walks the chunk in reverse time order.
    base = d * (Tc - 1)
    stride = 1 - 2 * d

    def step(i, h):
        t = base + i * stride
        row0 = pl.multiple_of(t * BB, BB)
        g = gi_scratch[pl.ds(row0, BB), :]                        # (BB, 3H)
        gh = jnp.dot(h.astype(whh.dtype), whh,
                     preferred_element_type=jnp.float32)          # (BB, 3H)
        # sigmoid(x) == 0.5*tanh(0.5*x) + 0.5 : one EUP op covers r and z.
        rz = 0.5 * jnp.tanh(0.5 * (g[:, :2 * H] + gh[:, :2 * H])) + 0.5
        r = rz[:, :H]
        z = rz[:, H:]
        n = jnp.tanh(g[:, 2 * H:] + r * (gh[:, 2 * H:] + b_hn))
        return (1.0 - z) * n + z * h

    h = lax.fori_loop(0, Tc, step, h_scratch[...],
                      unroll=True if Tc <= 8 else 8)
    h_scratch[...] = h

    @pl.when(c == nchunks - 1)
    def _():
        h_out_ref[0] = h


def bilinear_score_kernel(c_ref, r_ref, m_ref, b_ref, o_ref):
    """o_i = c_i @ M @ r_i + b   (== diag(c @ M @ r^T) + b)

    c_ref : (B, 2H)   r_ref : (B, 2H)   m_ref : (2H, 2H)
    b_ref : (1, 1) in SMEM               o_ref : (B, 1)
    """
    cm = jnp.dot(c_ref[...], m_ref[...], preferred_element_type=jnp.float32)
    o_ref[...] = jnp.sum(cm * r_ref[...], axis=-1, keepdims=True) + b_ref[0, 0]


# ---------------------------------------------------------------------------
# Wrappers around pallas_call
# ---------------------------------------------------------------------------
def gru_bidir(x_2d, wih, whh, b_gi, b_hn, batch, *, chunk_t=None):
    """x_2d: (T*BB, E) time-major rows (row = t*BB + b), bf16."""
    TB, E = x_2d.shape
    BB = batch
    T = TB // BB
    H = whh.shape[1]
    H3 = 3 * H
    if chunk_t is None:
        chunk_t = T
    assert T % chunk_t == 0, "chunk_t must divide the sequence length"
    nchunks = T // chunk_t

    # Forward direction walks chunks 0..n-1, backward walks n-1..0.
    x_map = lambda d, c: ((1 - d) * c + d * (nchunks - 1 - c), 0)
    w_map = lambda d, c: (d, 0, 0)

    return pl.pallas_call(
        gru_bidir_kernel,
        out_shape=jax.ShapeDtypeStruct((2, BB, H), jnp.float32),
        grid_spec=pltpu.PrefetchScalarGridSpec(
            num_scalar_prefetch=0,
            grid=(2, nchunks),
            in_specs=[
                pl.BlockSpec((chunk_t * BB, E), x_map),
                pl.BlockSpec((1, E, H3), w_map),
                pl.BlockSpec((1, H, H3), w_map),
                pl.BlockSpec((1, 1, H3), w_map),
                pl.BlockSpec((1, 1, H), w_map),
            ],
            out_specs=pl.BlockSpec((1, BB, H), lambda d, c: (d, 0, 0)),
            scratch_shapes=[
                pltpu.VMEM((BB, H), jnp.float32),
                pltpu.VMEM((chunk_t * BB, H3), jnp.float32),
            ],
        ),
        compiler_params=pltpu.CompilerParams(
            dimension_semantics=("parallel", "arbitrary")),
    )(x_2d, wih, whh, b_gi, b_hn)


def bilinear_score(c, r, M, b):
    B = c.shape[0]
    vmem = pl.BlockSpec(memory_space=pltpu.MemorySpace.VMEM)
    smem = pl.BlockSpec(memory_space=pltpu.MemorySpace.SMEM)
    # NOTE: (B, 1) output is a lane-sparse masked store; negligible at tiny B.
    return pl.pallas_call(
        bilinear_score_kernel,
        out_shape=jax.ShapeDtypeStruct((B, 1), jnp.float32),
        in_specs=[vmem, vmem, vmem, smem],
        out_specs=vmem,
    )(c, r, M, b.reshape(1, 1).astype(jnp.float32))


# ---------------------------------------------------------------------------
# Parameter construction (deterministic, mirrors biGRU.__init__ / init_params_)
# ---------------------------------------------------------------------------
def init_params(key, n_vocab, emb_dim, h_dim):
    keys = jax.random.split(key, 10)
    H = h_dim

    # Embedding: normal(0,1), padding_idx=0 row zeroed.
    emb = jax.random.normal(keys[0], (n_vocab, emb_dim), jnp.float32)
    emb = emb.at[0].set(0.0)

    bound = 1.0 / (h_dim ** 0.5)

    def direction(k_w, k_u, k_bi, k_bh, set_bias_slice):
        # Packed layout: (E, 3H) / (H, 3H), gate order [r|z|n] along lanes.
        wih = jax.random.uniform(k_w, (emb_dim, 3 * H), jnp.float32, -bound, bound)
        whh = jax.random.uniform(k_u, (H, 3 * H), jnp.float32, -bound, bound)
        bih = jax.random.uniform(k_bi, (3 * H,), jnp.float32, -bound, bound)
        bhh = jax.random.uniform(k_bh, (3 * H,), jnp.float32, -bound, bound)
        if set_bias_slice:
            # init_params_: bias[size//4 : size//2] = 2 (layer-0 forward dir only)
            size = 3 * H
            bih = bih.at[size // 4: size // 2].set(2.0)
            bhh = bhh.at[size // 4: size // 2].set(2.0)
        # Pre-fold the r/z input+hidden biases; keep b_hn separate (r * (gh_n+b_hn)).
        b_gi = jnp.concatenate([bih[:2 * H] + bhh[:2 * H], bih[2 * H:]]).reshape(1, 3 * H)
        b_hn = bhh[2 * H:].reshape(1, H)
        return wih.astype(jnp.bfloat16), whh.astype(jnp.bfloat16), b_gi, b_hn

    wf, uf, bgif, bhnf = direction(keys[1], keys[2], keys[3], keys[4], True)
    wb, ub, bgib, bhnb = direction(keys[5], keys[6], keys[7], keys[8], False)

    wih = jnp.stack([wf, wb])       # (2, E, 3H) bf16
    whh = jnp.stack([uf, ub])       # (2, H, 3H) bf16
    b_gi = jnp.stack([bgif, bgib])  # (2, 1, 3H) f32
    b_hn = jnp.stack([bhnf, bhnb])  # (2, 1, H)  f32

    # M: xavier normal over (2H, 2H)
    std = (2.0 / (4.0 * H)) ** 0.5
    M = std * jax.random.normal(keys[9], (2 * H, 2 * H), jnp.float32)
    b = jnp.zeros((1,), jnp.float32)   # torch.FloatTensor([0])

    return dict(emb=emb, wih=wih, whh=whh, b_gi=b_gi, b_hn=b_hn, M=M, b=b)


# ---------------------------------------------------------------------------
# Full forward (matches biGRU.forward semantics, eval mode)
# ---------------------------------------------------------------------------
@functools.partial(jax.jit, static_argnames=("chunk_t",))
def bigru_forward(params, x1, x2, *, chunk_t=None):
    emb = params["emb"]
    B, T = x1.shape
    # TODO(synk): nn.Dropout(emb_drop) is a no-op in eval mode; not implemented.
    # Gather embeddings directly in fused, time-major 2D layout (T*2B, E):
    # no (B,T,E)->(T,B,E) transpose copy and no materialized [::-1] reversal
    # (the backward direction reverses indices inside the kernel).
    idx = jnp.concatenate([x1, x2], axis=0).T.reshape(-1)      # (T*2B,)
    x_flat = jnp.take(emb, idx, axis=0).astype(jnp.bfloat16)   # (T*2B, E)

    h2 = gru_bidir(x_flat, params["wih"], params["whh"],
                   params["b_gi"], params["b_hn"], batch=2 * B,
                   chunk_t=chunk_t)                            # (2, 2B, H)

    h_all = jnp.concatenate([h2[0], h2[1]], axis=-1)           # (2B, 2H)
    c, r = h_all[:B], h_all[B:]
    o = bilinear_score(c, r, params["M"], params["b"])         # (B, 1)
    return o.reshape(-1)                                       # o.view(-1)


if __name__ == "__main__":
    B, T, E, H, V = 2, 8, 16, 32, 50

    key = jax.random.PRNGKey(0)
    k_params, k_x1, k_x2 = jax.random.split(key, 3)

    params = init_params(k_params, n_vocab=V, emb_dim=E, h_dim=H)
    x1 = jax.random.randint(k_x1, (B, T), 0, V, dtype=jnp.int32)
    x2 = jax.random.randint(k_x2, (B, T), 0, V, dtype=jnp.int32)

    out = bigru_forward(params, x1, x2, chunk_t=4)   # 2 time chunks per direction
    jax.block_until_ready(out)
    assert out.shape == (B,)
    print("KERNEL_OK")
</pallas_src>

<mosaic_0001>
module attributes {stable_mosaic.version = 11 : i64} {
  func.func @gru_bidir_kernel(%arg0: i32, %arg1: i32, %arg2: memref<16x16xbf16, #tpu.memory_space<vmem>>, %arg3: memref<1x16x96xbf16, #tpu.memory_space<vmem>>, %arg4: memref<1x32x96xbf16, #tpu.memory_space<vmem>>, %arg5: memref<1x1x96xf32, #tpu.memory_space<vmem>>, %arg6: memref<1x1x32xf32, #tpu.memory_space<vmem>>, %arg7: memref<1x4x32xf32, #tpu.memory_space<vmem>>, %arg8: memref<4x32xf32, #tpu.memory_space<vmem>>, %arg9: memref<16x96xf32, #tpu.memory_space<vmem>>) attributes {dimension_semantics = [#tpu.dimension_semantics<parallel>, #tpu.dimension_semantics<arbitrary>], iteration_bounds = array<i64: 2, 2>, scalar_prefetch = 0 : i64, scratch_operands = 2 : i64, tpu.core_type = #tpu.core_type<tc>, window_params = [{transform_indices = @transform_0, window_bounds = array<i64: 16, 16>}, {transform_indices = @transform_1, window_bounds = array<i64: 1, 16, 96>}, {transform_indices = @transform_2, window_bounds = array<i64: 1, 32, 96>}, {transform_indices = @transform_3, window_bounds = array<i64: 1, 1, 96>}, {transform_indices = @transform_4, window_bounds = array<i64: 1, 1, 32>}, {transform_indices = @transform_5, window_bounds = array<i64: 1, 4, 32>}]} {
    %c0_i32 = arith.constant 0 : i32
    %0 = arith.cmpi eq, %arg1, %c0_i32 : i32
    %1 = arith.extui %0 : i1 to i32
    %c0_i32_0 = arith.constant 0 : i32
    %2 = arith.cmpi ne, %1, %c0_i32_0 : i32
    scf.if %2 {
      %cst_54 = arith.constant 0.000000e+00 : f32
      %152 = vector.broadcast %cst_54 : f32 to vector<4x32xf32>
      %c0_55 = arith.constant 0 : index
      %c0_56 = arith.constant 0 : index
      %153 = vector.load %arg8[%c0_55, %c0_56] : memref<4x32xf32, #tpu.memory_space<vmem>>, vector<4x32xf32>
      tpu.vector_store %arg8[%c0_55, %c0_56], %152 {strides = array<i32>} : memref<4x32xf32, #tpu.memory_space<vmem>>, vector<4x32xf32>,
    } else {
    }
    %c0 = arith.constant 0 : index
    %c0_1 = arith.constant 0 : index
    %3 = vector.load %arg2[%c0, %c0_1] : memref<16x16xbf16, #tpu.memory_space<vmem>>, vector<16x16xbf16>
    %c0_2 = arith.constant 0 : index
    %c0_3 = arith.constant 0 : index
    %c0_4 = arith.constant 0 : index
    %4 = vector.load %arg3[%c0_2, %c0_3, %c0_4] : memref<1x16x96xbf16, #tpu.memory_space<vmem>>, vector<1x16x96xbf16>
    %5 = vector.shape_cast %4 : vector<1x16x96xbf16> to vector<16x96xbf16>
    %cst = arith.constant dense<0.000000e+00> : vector<16x96xf32>
    %6 = tpu.matmul %3, %5, %cst {dimension_numbers = #tpu.dot_dimension_numbers<[1], [0], [0], [1], [0, 0, 1, 1], [], []>} : vector<16x16xbf16>, vector<16x96xbf16>, vector<16x96xf32> -> vector<16x96xf32>
    %c0_5 = arith.constant 0 : index
    %c0_6 = arith.constant 0 : index
    %c0_7 = arith.constant 0 : index
    %7 = vector.load %arg5[%c0_5, %c0_6, %c0_7] : memref<1x1x96xf32, #tpu.memory_space<vmem>>, vector<1x1x96xf32>
    %8 = vector.shape_cast %7 : vector<1x1x96xf32> to vector<1x96xf32>
    %9 = vector.broadcast %8 : vector<1x96xf32> to vector<16x96xf32>
    %10 = arith.addf %6, %9 : vector<16x96xf32>
    %c0_8 = arith.constant 0 : index
    %c0_9 = arith.constant 0 : index
    %11 = vector.load %arg9[%c0_8, %c0_9] : memref<16x96xf32, #tpu.memory_space<vmem>>, vector<16x96xf32>
    tpu.vector_store %arg9[%c0_8, %c0_9], %10 {strides = array<i32>} : memref<16x96xf32, #tpu.memory_space<vmem>>, vector<16x96xf32>,
    %c0_10 = arith.constant 0 : index
    %c0_11 = arith.constant 0 : index
    %c0_12 = arith.constant 0 : index
    %12 = vector.load %arg4[%c0_10, %c0_11, %c0_12] : memref<1x32x96xbf16, #tpu.memory_space<vmem>>, vector<1x32x96xbf16>
    %13 = vector.shape_cast %12 : vector<1x32x96xbf16> to vector<32x96xbf16>
    %c0_13 = arith.constant 0 : index
    %c0_14 = arith.constant 0 : index
    %c0_15 = arith.constant 0 : index
    %14 = vector.load %arg6[%c0_13, %c0_14, %c0_15] : memref<1x1x32xf32, #tpu.memory_space<vmem>>, vector<1x1x32xf32>
    %15 = vector.shape_cast %14 : vector<1x1x32xf32> to vector<1x32xf32>
    %c3_i32 = arith.constant 3 : i32
    %16 = arith.muli %arg0, %c3_i32 : i32
    %c2_i32 = arith.constant 2 : i32
    %17 = arith.muli %c2_i32, %arg0 : i32
    %c1_i32 = arith.constant 1 : i32
    %18 = arith.subi %c1_i32, %17 : i32
    %c0_16 = arith.constant 0 : index
    %c0_17 = arith.constant 0 : index
    %19 = vector.load %arg8[%c0_16, %c0_17] : memref<4x32xf32, #tpu.memory_space<vmem>>, vector<4x32xf32>
    %c0_i32_18 = arith.constant 0 : i32
    %20 = arith.muli %c0_i32_18, %18 : i32
    %21 = arith.addi %16, %20 : i32
    %c4_i32 = arith.constant 4 : i32
    %22 = arith.muli %21, %c4_i32 : i32
    %23 = tpu.assume_multiple %22, 4 : i32
    %24 = arith.index_cast %23 : i32 to index
    %c0_19 = arith.constant 0 : index
    %25 = vector.load %arg9[%24, %c0_19] : memref<16x96xf32, #tpu.memory_space<vmem>>, vector<4x96xf32>
    %26 = arith.truncf %19 : vector<4x32xf32> to vector<4x32xbf16>
    %cst_20 = arith.constant dense<0.000000e+00> : vector<4x96xf32>
    %27 = tpu.matmul %26, %13, %cst_20 {dimension_numbers = #tpu.dot_dimension_numbers<[1], [0], [0], [1], [0, 0, 1, 1], [], []>} : vector<4x32xbf16>, vector<32x96xbf16>, vector<4x96xf32> -> vector<4x96xf32>
    %28 = vector.extract_strided_slice %25 {offsets = [0, 0], sizes = [4, 64], strides = [1, 1]} : vector<4x96xf32> to vector<4x64xf32>
    %29 = vector.extract_strided_slice %27 {offsets = [0, 0], sizes = [4, 64], strides = [1, 1]} : vector<4x96xf32> to vector<4x64xf32>
    %30 = arith.addf %28, %29 : vector<4x64xf32>
    %cst_21 = arith.constant 5.000000e-01 : f32
    %31 = vector.broadcast %cst_21 : f32 to vector<4x64xf32>
    %32 = arith.mulf %31, %30 : vector<4x64xf32>
    %33 = math.tanh %32 : vector<4x64xf32>
    %cst_22 = arith.constant 5.000000e-01 : f32
    %34 = vector.broadcast %cst_22 : f32 to vector<4x64xf32>
    %35 = arith.mulf %34, %33 : vector<4x64xf32>
    %cst_23 = arith.constant 5.000000e-01 : f32
    %36 = vector.broadcast %cst_23 : f32 to vector<4x64xf32>
    %37 = arith.addf %35, %36 : vector<4x64xf32>
    %38 = vector.extract_strided_slice %37 {offsets = [0, 0], sizes = [4, 32], strides = [1, 1]} : vector<4x64xf32> to vector<4x32xf32>
    %39 = vector.extract_strided_slice %37 {offsets = [0, 32], sizes = [4, 32], strides = [1, 1]} : vector<4x64xf32> to vector<4x32xf32>
    %40 = vector.extract_strided_slice %25 {offsets = [0, 64], sizes = [4, 32], strides = [1, 1]} : vector<4x96xf32> to vector<4x32xf32>
    %41 = vector.extract_strided_slice %27 {offsets = [0, 64], sizes = [4, 32], strides = [1, 1]} : vector<4x96xf32> to vector<4x32xf32>
    %42 = vector.broadcast %15 : vector<1x32xf32> to vector<4x32xf32>
    %43 = arith.addf %41, %42 : vector<4x32xf32>
    %44 = arith.mulf %38, %43 : vector<4x32xf32>
    %45 = arith.addf %40, %44 : vector<4x32xf32>
    %46 = math.tanh %45 : vector<4x32xf32>
    %cst_24 = arith.constant 1.000000e+00 : f32
    %47 = vector.broadcast %cst_24 : f32 to vector<4x32xf32>
    %48 = arith.subf %47, %39 : vector<4x32xf32>
    %49 = arith.mulf %48, %46 : vector<4x32xf32>
    %50 = arith.mulf %39, %19 : vector<4x32xf32>
    %51 = arith.addf %49, %50 : vector<4x32xf32>
    %c1_i32_25 = arith.constant 1 : i32
    %52 = arith.muli %c1_i32_25, %18 : i32
    %53 = arith.addi %16, %52 : i32
    %c4_i32_26 = arith.constant 4 : i32
    %54 = arith.muli %53, %c4_i32_26 : i32
    %55 = tpu.assume_multiple %54, 4 : i32
    %56 = arith.index_cast %55 : i32 to index
    %c0_27 = arith.constant 0 : index
    %57 = vector.load %arg9[%56, %c0_27] : memref<16x96xf32, #tpu.memory_space<vmem>>, vector<4x96xf32>
    %58 = arith.truncf %51 : vector<4x32xf32> to vector<4x32xbf16>
    %cst_28 = arith.constant dense<0.000000e+00> : vector<4x96xf32>
    %59 = tpu.matmul %58, %13, %cst_28 {dimension_numbers = #tpu.dot_dimension_numbers<[1], [0], [0], [1], [0, 0, 1, 1], [], []>} : vector<4x32xbf16>, vector<32x96xbf16>, vector<4x96xf32> -> vector<4x96xf32>
    %60 = vector.extract_strided_slice %57 {offsets = [0, 0], sizes = [4, 64], strides = [1, 1]} : vector<4x96xf32> to vector<4x64xf32>
    %61 = vector.extract_strided_slice %59 {offsets = [0, 0], sizes = [4, 64], strides = [1, 1]} : vector<4x96xf32> to vector<4x64xf32>
    %62 = arith.addf %60, %61 : vector<4x64xf32>
    %cst_29 = arith.constant 5.000000e-01 : f32
    %63 = vector.broadcast %cst_29 : f32 to vector<4x64xf32>
    %64 = arith.mulf %63, %62 : vector<4x64xf32>
    %65 = math.tanh %64 : vector<4x64xf32>
    %cst_30 = arith.constant 5.000000e-01 : f32
    %66 = vector.broadcast %cst_30 : f32 to vector<4x64xf32>
    %67 = arith.mulf %66, %65 : vector<4x64xf32>
    %cst_31 = arith.constant 5.000000e-01 : f32
    %68 = vector.broadcast %cst_31 : f32 to vector<4x64xf32>
    %69 = arith.addf %67, %68 : vector<4x64xf32>
    %70 = vector.extract_strided_slice %69 {offsets = [0, 0], sizes = [4, 32], strides = [1, 1]} : vector<4x64xf32> to vector<4x32xf32>
    %71 = vector.extract_strided_slice %69 {offsets = [0, 32], sizes = [4, 32], strides = [1, 1]} : vector<4x64xf32> to vector<4x32xf32>
    %72 = vector.extract_strided_slice %57 {offsets = [0, 64], sizes = [4, 32], strides = [1, 1]} : vector<4x96xf32> to vector<4x32xf32>
    %73 = vector.extract_strided_slice %59 {offsets = [0, 64], sizes = [4, 32], strides = [1, 1]} : vector<4x96xf32> to vector<4x32xf32>
    %74 = vector.broadcast %15 : vector<1x32xf32> to vector<4x32xf32>
    %75 = arith.addf %73, %74 : vector<4x32xf32>
    %76 = arith.mulf %70, %75 : vector<4x32xf32>
    %77 = arith.addf %72, %76 : vector<4x32xf32>
    %78 = math.tanh %77 : vector<4x32xf32>
    %cst_32 = arith.constant 1.000000e+00 : f32
    %79 = vector.broadcast %cst_32 : f32 to vector<4x32xf32>
    %80 = arith.subf %79, %71 : vector<4x32xf32>
    %81 = arith.mulf %80, %78 : vector<4x32xf32>
    %82 = arith.mulf %71, %51 : vector<4x32xf32>
    %83 = arith.addf %81, %82 : vector<4x32xf32>
    %c2_i32_33 = arith.constant 2 : i32
    %84 = arith.muli %c2_i32_33, %18 : i32
    %85 = arith.addi %16, %84 : i32
    %c4_i32_34 = arith.constant 4 : i32
    %86 = arith.muli %85, %c4_i32_34 : i32
    %87 = tpu.assume_multiple %86, 4 : i32
    %88 = arith.index_cast %87 : i32 to index
    %c0_35 = arith.constant 0 : index
    %89 = vector.load %arg9[%88, %c0_35] : memref<16x96xf32, #tpu.memory_space<vmem>>, vector<4x96xf32>
    %90 = arith.truncf %83 : vector<4x32xf32> to vector<4x32xbf16>
    %cst_36 = arith.constant dense<0.000000e+00> : vector<4x96xf32>
    %91 = tpu.matmul %90, %13, %cst_36 {dimension_numbers = #tpu.dot_dimension_numbers<[1], [0], [0], [1], [0, 0, 1, 1], [], []>} : vector<4x32xbf16>, vector<32x96xbf16>, vector<4x96xf32> -> vector<4x96xf32>
    %92 = vector.extract_strided_slice %89 {offsets = [0, 0], sizes = [4, 64], strides = [1, 1]} : vector<4x96xf32> to vector<4x64xf32>
    %93 = vector.extract_strided_slice %91 {offsets = [0, 0], sizes = [4, 64], strides = [1, 1]} : vector<4x96xf32> to vector<4x64xf32>
    %94 = arith.addf %92, %93 : vector<4x64xf32>
    %cst_37 = arith.constant 5.000000e-01 : f32
    %95 = vector.broadcast %cst_37 : f32 to vector<4x64xf32>
    %96 = arith.mulf %95, %94 : vector<4x64xf32>
    %97 = math.tanh %96 : vector<4x64xf32>
    %cst_38 = arith.constant 5.000000e-01 : f32
    %98 = vector.broadcast %cst_38 : f32 to vector<4x64xf32>
    %99 = arith.mulf %98, %97 : vector<4x64xf32>
    %cst_39 = arith.constant 5.000000e-01 : f32
    %100 = vector.broadcast %cst_39 : f32 to vector<4x64xf32>
    %101 = arith.addf %99, %100 : vector<4x64xf32>
    %102 = vector.extract_strided_slice %101 {offsets = [0, 0], sizes = [4, 32], strides = [1, 1]} : vector<4x64xf32> to vector<4x32xf32>
    %103 = vector.extract_strided_slice %101 {offsets = [0, 32], sizes = [4, 32], strides = [1, 1]} : vector<4x64xf32> to vector<4x32xf32>
    %104 = vector.extract_strided_slice %89 {offsets = [0, 64], sizes = [4, 32], strides = [1, 1]} : vector<4x96xf32> to vector<4x32xf32>
    %105 = vector.extract_strided_slice %91 {offsets = [0, 64], sizes = [4, 32], strides = [1, 1]} : vector<4x96xf32> to vector<4x32xf32>
    %106 = vector.broadcast %15 : vector<1x32xf32> to vector<4x32xf32>
    %107 = arith.addf %105, %106 : vector<4x32xf32>
    %108 = arith.mulf %102, %107 : vector<4x32xf32>
    %109 = arith.addf %104, %108 : vector<4x32xf32>
    %110 = math.tanh %109 : vector<4x32xf32>
    %cst_40 = arith.constant 1.000000e+00 : f32
    %111 = vector.broadcast %cst_40 : f32 to vector<4x32xf32>
    %112 = arith.subf %111, %103 : vector<4x32xf32>
    %113 = arith.mulf %112, %110 : vector<4x32xf32>
    %114 = arith.mulf %103, %83 : vector<4x32xf32>
    %115 = arith.addf %113, %114 : vector<4x32xf32>
    %c3_i32_41 = arith.constant 3 : i32
    %116 = arith.muli %c3_i32_41, %18 : i32
    %117 = arith.addi %16, %116 : i32
    %c4_i32_42 = arith.constant 4 : i32
    %118 = arith.muli %117, %c4_i32_42 : i32
    %119 = tpu.assume_multiple %118, 4 : i32
    %120 = arith.index_cast %119 : i32 to index
    %c0_43 = arith.constant 0 : index
    %121 = vector.load %arg9[%120, %c0_43] : memref<16x96xf32, #tpu.memory_space<vmem>>, vector<4x96xf32>
    %122 = arith.truncf %115 : vector<4x32xf32> to vector<4x32xbf16>
    %cst_44 = arith.constant dense<0.000000e+00> : vector<4x96xf32>
    %123 = tpu.matmul %122, %13, %cst_44 {dimension_numbers = #tpu.dot_dimension_numbers<[1], [0], [0], [1], [0, 0, 1, 1], [], []>} : vector<4x32xbf16>, vector<32x96xbf16>, vector<4x96xf32> -> vector<4x96xf32>
    %124 = vector.extract_strided_slice %121 {offsets = [0, 0], sizes = [4, 64], strides = [1, 1]} : vector<4x96xf32> to vector<4x64xf32>
    %125 = vector.extract_strided_slice %123 {offsets = [0, 0], sizes = [4, 64], strides = [1, 1]} : vector<4x96xf32> to vector<4x64xf32>
    %126 = arith.addf %124, %125 : vector<4x64xf32>
    %cst_45 = arith.constant 5.000000e-01 : f32
    %127 = vector.broadcast %cst_45 : f32 to vector<4x64xf32>
    %128 = arith.mulf %127, %126 : vector<4x64xf32>
    %129 = math.tanh %128 : vector<4x64xf32>
    %cst_46 = arith.constant 5.000000e-01 : f32
    %130 = vector.broadcast %cst_46 : f32 to vector<4x64xf32>
    %131 = arith.mulf %130, %129 : vector<4x64xf32>
    %cst_47 = arith.constant 5.000000e-01 : f32
    %132 = vector.broadcast %cst_47 : f32 to vector<4x64xf32>
    %133 = arith.addf %131, %132 : vector<4x64xf32>
    %134 = vector.extract_strided_slice %133 {offsets = [0, 0], sizes = [4, 32], strides = [1, 1]} : vector<4x64xf32> to vector<4x32xf32>
    %135 = vector.extract_strided_slice %133 {offsets = [0, 32], sizes = [4, 32], strides = [1, 1]} : vector<4x64xf32> to vector<4x32xf32>
    %136 = vector.extract_strided_slice %121 {offsets = [0, 64], sizes = [4, 32], strides = [1, 1]} : vector<4x96xf32> to vector<4x32xf32>
    %137 = vector.extract_strided_slice %123 {offsets = [0, 64], sizes = [4, 32], strides = [1, 1]} : vector<4x96xf32> to vector<4x32xf32>
    %138 = vector.broadcast %15 : vector<1x32xf32> to vector<4x32xf32>
    %139 = arith.addf %137, %138 : vector<4x32xf32>
    %140 = arith.mulf %134, %139 : vector<4x32xf32>
    %141 = arith.addf %136, %140 : vector<4x32xf32>
    %142 = math.tanh %141 : vector<4x32xf32>
    %cst_48 = arith.constant 1.000000e+00 : f32
    %143 = vector.broadcast %cst_48 : f32 to vector<4x32xf32>
    %144 = arith.subf %143, %135 : vector<4x32xf32>
    %145 = arith.mulf %144, %142 : vector<4x32xf32>
    %146 = arith.mulf %135, %115 : vector<4x32xf32>
    %147 = arith.addf %145, %146 : vector<4x32xf32>
    %c4_i32_49 = arith.constant 4 : i32
    %c0_50 = arith.constant 0 : index
    %c0_51 = arith.constant 0 : index
    %148 = vector.load %arg8[%c0_50, %c0_51] : memref<4x32xf32, #tpu.memory_space<vmem>>, vector<4x32xf32>
    tpu.vector_store %arg8[%c0_50, %c0_51], %147 {strides = array<i32>} : memref<4x32xf32, #tpu.memory_space<vmem>>, vector<4x32xf32>,
    %c1_i32_52 = arith.constant 1 : i32
    %149 = arith.cmpi eq, %arg1, %c1_i32_52 : i32
    %150 = arith.extui %149 : i1 to i32
    %c0_i32_53 = arith.constant 0 : i32
    %151 = arith.cmpi ne, %150, %c0_i32_53 : i32
    scf.if %151 {
      %c0_54 = arith.constant 0 : index
      %c0_55 = arith.constant 0 : index
      %c0_56 = arith.constant 0 : index
      %152 = vector.load %arg7[%c0_54, %c0_55, %c0_56] : memref<1x4x32xf32, #tpu.memory_space<vmem>>, vector<1x4x32xf32>
      %153 = vector.shape_cast %152 : vector<1x4x32xf32> to vector<4x32xf32>
      %154 = vector.shape_cast %147 : vector<4x32xf32> to vector<1x4x32xf32>
      tpu.vector_store %arg7[%c0_54, %c0_55, %c0_56], %154 {strides = array<i32>} : memref<1x4x32xf32, #tpu.memory_space<vmem>>, vector<1x4x32xf32>,
    } else {
    }
    return
  }
  func.func @transform_0(%arg0: i32, %arg1: i32) -> (i32, i32) {
    %c1_i32 = arith.constant 1 : i32
    %0 = arith.subi %c1_i32, %arg0 : i32
    %1 = arith.muli %0, %arg1 : i32
    %c1_i32_0 = arith.constant 1 : i32
    %2 = arith.subi %c1_i32_0, %arg1 : i32
    %3 = arith.muli %arg0, %2 : i32
    %4 = arith.addi %1, %3 : i32
    %c0_i32 = arith.constant 0 : i32
    %c0_i32_1 = arith.constant 0 : i32
    return %4, %c0_i32 : i32, i32
  }
  func.func @transform_1(%arg0: i32, %arg1: i32) -> (i32, i32, i32) {
    %c0_i32 = arith.constant 0 : i32
    %c0_i32_0 = arith.constant 0 : i32
    %c0_i32_1 = arith.constant 0 : i32
    return %arg0, %c0_i32, %c0_i32_0 : i32, i32, i32
  }
  func.func @transform_2(%arg0: i32, %arg1: i32) -> (i32, i32, i32) {
    %c0_i32 = arith.constant 0 : i32
    %c0_i32_0 = arith.constant 0 : i32
    %c0_i32_1 = arith.constant 0 : i32
    return %arg0, %c0_i32, %c0_i32_0 : i32, i32, i32
  }
  func.func @transform_3(%arg0: i32, %arg1: i32) -> (i32, i32, i32) {
    %c0_i32 = arith.constant 0 : i32
    %c0_i32_0 = arith.constant 0 : i32
    %c0_i32_1 = arith.constant 0 : i32
    return %arg0, %c0_i32, %c0_i32_0 : i32, i32, i32
  }
  func.func @transform_4(%arg0: i32, %arg1: i32) -> (i32, i32, i32) {
    %c0_i32 = arith.constant 0 : i32
    %c0_i32_0 = arith.constant 0 : i32
    %c0_i32_1 = arith.constant 0 : i32
    return %arg0, %c0_i32, %c0_i32_0 : i32, i32, i32
  }
  func.func @transform_5(%arg0: i32, %arg1: i32) -> (i32, i32, i32) {
    %c0_i32 = arith.constant 0 : i32
    %c0_i32_0 = arith.constant 0 : i32
    %c0_i32_1 = arith.constant 0 : i32
    return %arg0, %c0_i32, %c0_i32_0 : i32, i32, i32
  }
}

module attributes {stable_mosaic.version = 11 : i64} {
  func.func @bilinear_score_kernel(%arg0: memref<2x64xf32, #tpu.memory_space<vmem>>, %arg1: memref<2x64xf32, #tpu.memory_space<vmem>>, %arg2: memref<64x64xf32, #tpu.memory_space<vmem>>, %arg3: memref<1x1xf32, #tpu.memory_space<smem>>, %arg4: memref<2x1xf32, #tpu.memory_space<vmem>>) attributes {dimension_semantics = [], scalar_prefetch = 0 : i64, scratch_operands = 0 : i64, tpu.core_type = #tpu.core_type<tc>} {
    %c0 = arith.constant 0 : index
    %c0_0 = arith.constant 0 : index
    %0 = vector.load %arg0[%c0, %c0_0] : memref<2x64xf32, #tpu.memory_space<vmem>>, vector<2x64xf32>
    %c0_1 = arith.constant 0 : index
    %c0_2 = arith.constant 0 : index
    %1 = vector.load %arg2[%c0_1, %c0_2] : memref<64x64xf32, #tpu.memory_space<vmem>>, vector<64x64xf32>
    %cst = arith.constant dense<0.000000e+00> : vector<2x64xf32>
    %2 = tpu.matmul %0, %1, %cst {dimension_numbers = #tpu.dot_dimension_numbers<[1], [0], [0], [1], [0, 0, 1, 1], [], []>} : vector<2x64xf32>, vector<64x64xf32>, vector<2x64xf32> -> vector<2x64xf32>
    %c0_3 = arith.constant 0 : index
    %c0_4 = arith.constant 0 : index
    %3 = vector.load %arg1[%c0_3, %c0_4] : memref<2x64xf32, #tpu.memory_space<vmem>>, vector<2x64xf32>
    %4 = arith.mulf %2, %3 : vector<2x64xf32>
    %cst_5 = arith.constant dense<0.000000e+00> : vector<2xf32>
    %5 = vector.multi_reduction <add>, %4, %cst_5 [1] : vector<2x64xf32> to vector<2xf32>
    %6 = vector.shape_cast %5 : vector<2xf32> to vector<2x1xf32>
    %c0_6 = arith.constant 0 : index
    %c0_7 = arith.constant 0 : index
    %7 = memref.load %arg3[%c0_6, %c0_7] : memref<1x1xf32, #tpu.memory_space<smem>>
    %8 = vector.broadcast %7 : f32 to vector<2x1xf32>
    %9 = arith.addf %6, %8 : vector<2x1xf32>
    %c0_8 = arith.constant 0 : index
    %c0_9 = arith.constant 0 : index
    %10 = vector.load %arg4[%c0_8, %c0_9] : memref<2x1xf32, #tpu.memory_space<vmem>>, vector<2x1xf32>
    tpu.vector_store %arg4[%c0_8, %c0_9], %9 {strides = array<i32>} : memref<2x1xf32, #tpu.memory_space<vmem>>, vector<2x1xf32>,
    return
  }
}

</mosaic_0001>

<bundles_post_ra>
// kernel: bigru_forward.3
= control target key start
LH: loop header
LB: loop body
LE: loop exit
PB: predicated region body
PF: predicated region fallthrough
CT: control target
= control target key end

     0   :  { %v147_v0 = vmov 0.0   ;;  %vm148_vm0 = vmmov 0   ;;  %vm27_vm1 = vcmask 523264   ;;  %vm103_vm2 = vcmask 517120   ;;  %s210_s2 = inlined_call_operand.vmem [shape: f32[64,64], index: 2, kind: input, shape index: {}]   ;;  %s211_s0 = inlined_call_operand.vmem [shape: f32[2,64], index: 0, kind: input, shape index: {}]   ;;  %s212_s1 = inlined_call_operand.vmem [shape: f32[2,64], index: 1, kind: input, shape index: {}]   ;;  %s213_s3 = inlined_call_operand.<no memory space> [shape: f32[1,1], index: 3, kind: input, shape index: {}]   ;;  %s214_s4 = inlined_call_operand.vmem [shape: f32[2,1], index: 4, kind: output, shape index: {}]  }
   0x1   :  { %126 = vmatprep.subr.mxu0 %v147_v0  ;;  %v26_v1 = vld [vmem:[%s210_s2 + $0x38] sm:$0xff]  ;;  %v25_v2 = vld [vmem:[%s210_s2 + $0x30] sm:$0xff]  ;;  %142 = vmatprep.mubr.msk.f32.mxu0 %vm148_vm0, %v147_v0  ;;  %v24_v3 = vld [vmem:[%s210_s2 + $0x28] sm:$0xff]  ;;  %v108_v15 = vstv %s213_s3  ;;  %vm110_vm3 = vcmask 1024  }
   0x2   :  { %127 = vmatpush3.msra.mxu0 %v26_v1  ;;  %v23_v4 = vld [vmem:[%s210_s2 + $0x20] sm:$0xff]  ;;  %v22_v5 = vld [vmem:[%s210_s2 + $0x18] sm:$0xff]  ;;  %v21_v6 = vld [vmem:[%s210_s2 + $0x10] sm:$0xff] }
   0x3   :  { %128 = vmatprep.subr.mxu0 %v147_v0  ;;  %v20_v7 = vld [vmem:[%s210_s2 + $0x8] sm:$0xff]  ;;  %v19_v8 = vld [vmem:[%s210_s2] sm:$0xff] }
   0x4   :  { %129 = vmatpush3.msra.mxu0 %v25_v2  ;;  %v18_v9 = vld [vmem:[%s211_s0] sm:$0x3] }
   0x5   :  { %130 = vmatprep.subr.mxu0 %v147_v0  ;;  %v101_v10 = vld [vmem:[%s212_s1] sm:$0x3] }
   0x6   :  { %131 = vmatpush3.msra.mxu0 %v24_v3 }
   0x7   :  { %132 = vmatprep.subr.mxu0 %v147_v0 }
   0x8   :  { %133 = vmatpush3.msra.mxu0 %v23_v4 }
   0x9   :  { %134 = vmatprep.subr.mxu0 %v147_v0 }
   0xa   :  { %135 = vmatpush3.msra.mxu0 %v22_v5 }
   0xb   :  { %136 = vmatprep.subr.mxu0 %v147_v0 }
   0xc   :  { %137 = vmatpush3.msra.mxu0 %v21_v6 }
   0xd   :  { %138 = vmatprep.subr.mxu0 %v147_v0 }
   0xe   :  { %139 = vmatpush3.msra.mxu0 %v20_v7 }
   0xf   :  { %140 = vmatprep.subr.mxu0 %v147_v0 }
  0x10   :  { %141 = vmatpush3.msra.mxu0 %v19_v8 }
  0x11   :  { %143 = vmatmul.mubr.msk.f32.vlgmr.msra.gmra.mxu0 %vm27_vm1, %v18_v9 }
  0xd1   :  { %v97_v11 = vpop.f32.mrf.mxu0 }
  0xd2   :  { %v102_v12 = vmul.f32 %v101_v10, %v97_v11 }
  0xd3   :  { %v144_v13 = vpop.f32.mrf.mxu0 }
  0xd4   :  { %v104_v14 = vsel %vm103_vm2, %v102_v12, 0.0 }
  0xd5   :  { %105 = vadd.xlane.f32.xlu0 %v104_v14 }
 0x15e   :  { %v106_v16 = vpop.xlane.xlu0 %105 }
 0x15f   :  { %v109_v17 = vadd.f32 %v108_v15, %v106_v16 }
 0x161   :  { %111 = vst.msk [vmem:[%s214_s4] sm:$0x3] %vm110_vm3, %v109_v17 }

// kernel: bigru_forward.2
= control target key start
LH: loop header
LB: loop body
LE: loop exit
PB: predicated region body
PF: predicated region fallthrough
CT: control target
= control target key end

     0   :  { %s1114_s18 = smov 0   ;;  %s1116_s19 = smov 0   ;;  %s1281_s0 = inlined_call_operand.vmem [shape: bf16[32,16], index: 0, kind: input, shape index: {}]   ;;  %s1282_s1 = inlined_call_operand.vmem [shape: bf16[2,16,96], index: 1, kind: input, shape index: {}]   ;;  %s1283_s2 = inlined_call_operand.vmem [shape: bf16[2,32,96], index: 2, kind: input, shape index: {}]   ;;  %s1284_s3 = inlined_call_operand.vmem [shape: f32[2,1,96], index: 3, kind: input, shape index: {}]   ;;  %s1285_s4 = inlined_call_operand.vmem [shape: f32[2,1,32], index: 4, kind: input, shape index: {}]   ;;  %s1286_s5 = inlined_call_operand.vmem [shape: f32[2,4,32], index: 5, kind: output, shape index: {}]  }
   0x1   :  { %s1118_s20 = smov 0   ;;  %s1120_s21 = smov 0  }
   0x2   :  { %s1122_s22 = smov 0  }
   0x3 LB: > { %s24_s23 = sadd.s32 1, %s1068_s20  ;;  %s27_s24 = sadd.s32 1, %s1072_s21  ;;  %s1076_s22 = sphi %s1122_s22, %s15_s22   ;;  %s1072_s21 = sphi %s1120_s21, %s1294_s21   ;;  %s1068_s20 = sphi %s1118_s20, %s1293_s20   ;;  %s1064_s19 = sphi %s1116_s19, %s1292_s19   ;;  %s1060_s18 = sphi %s1114_s18, %s1291_s18  }
   0x4   : > { %p25_p0 = scmp.ge.s32.totalorder %s24_s23, 2  ;;  %p890_p1 = scmp.ge.s32.totalorder %s1076_s22, 1 }
   0x5   : > { %p256_p2 = scmp.lt.s32.totalorder %s1076_s22, 5 }
   0x6   : > { %s1296_s23 = smov (%p25_p0, %s24_s23), 0  ;;  %s1298_s24 = smov (!%p25_p0, %s27_s24), %s1072_s21 }
   0x7   : > { %1287 = sst [smem:[#allocation4_spill]] %s1296_s23  ;;  %p257_p3 = pnand %p890_p1, %p256_p2 }
   0x8   : > { %p29_p4 = scmp.ge.s32.totalorder %s1298_s24, 2  ;;  %s304_s25 = ssub.s32 (!%p257_p3), 1, %s1064_s19 }
   0x9   : > { %260 = sbr.rel (%p257_p3) target bundleno = 2755 (0xac3), region = 40  ;;  %s306_s26 = ssub.s32 (!%p257_p3), 1, %s1060_s18 }
   0xa   : > { %s1300_s24 = smov (%p29_p4, %s1298_s24), 0  ;;  %s305_s27 = smul.u32 (!%p257_p3), %s1060_s18, %s304_s25 }
   0xb   : > { %1288 = sst [smem:[#allocation5_spill]] %s1300_s24  ;;  %p320_p5 = scmp.lt.s32.totalorder (!%p257_p3), %s1064_s19, 1 }
   0xc   : > { %s307_s28 = smul.u32 (!%p257_p3), %s1064_s19, %s306_s26  ;;  %p898_p7 = scmp.ne.s32.totalorder (!%p257_p3), %s1060_s18, 0 }
   0xe   : > { %s1154_s29 = scalar_select %p320_p5, %s1064_s19, 1 }
   0xf   : > { %s308_s30 = sadd.s32 %s307_s28, %s305_s27 }
  0x10   : > { %s891_s6 = sshll.u32 %s308_s30, 1  ;;  %s918_s7 = sshll.u32 %s1154_s29, 3 }
  0x11   : > { %p310_p6 = scmp.lt.s32.totalorder %s891_s6, 3  ;;  %s324_s10 = scalar_lea.vmem %s1282_s1, %s918_s7 }
  0x12   : > { %s919_s11 = sshll.u32 %s1154_s29, 4  ;;  %s332_s14 = scalar_lea.vmem %s1284_s3, %s1154_s29 }
  0x13   : > { %s1302_s6 = smov (!%p310_p6, %s891_s6), 3  ;;  %s329_s17 = scalar_lea.vmem %s1283_s2, %s919_s11 }
  0x14   : > { %s335_s27 = scalar_lea.vmem %s1285_s4, %s1154_s29  ;;  %s892_s28 = sshll.u32 %s1302_s6, 2 }
  0x15   : > { %s897_s30 = sshll.u32 %s1154_s29, 2  ;;  %s313_s7 = scalar_lea.vmem %s1281_s0, %s892_s28 }
  0x16   : > { %s1179_s12 = scalar_lea.vmem %s1286_s5, %s897_s30  ;;  %344 = sbr.rel (%p898_p7) target bundleno = 29 (0x1d), region = 44 }
  0x1b   : > { %vm345_vm0 = vcmask 257024   ;;  %v1078_v0 = vmov 0.0  }
  0x1c   : > { %346 = vst.msk [vmem:[#allocation2] sm:$0xf] %vm345_vm0, %v1078_v0 }
  0x1d PF: > { %v1018_v1 = vld [vmem:[%s324_s10] sm:$0xff]   ;;  %v1079_v2 = vmov 0.0   ;;  %v1184_v3 = vld [vmem:[%s329_s17 + $0x8] sm:$0xff]   ;;  %vm1080_vm1 = vmmov 0   ;;  %vm369_vm2 = vcmask 130048   ;;  %s1081_s23 = smov 64  }
  0x1e   : > { %934 = vmatprep.subr.bf16.mxu0 %v1079_v2  ;;  %940 = vmatprep.subr.bf16.mxu1 %v1079_v2  ;;  %v1020_v4 = vld [vmem:[%s313_s7] sm:$0xff]   ;;  %vm442_vm3 = vcmask 261120   ;;  %s903_s24 = sshll.u32 %s1064_s19, 1  ;;  %s1214_s10 = smul.u32 3, %s1064_s19  ;;  %vm414_vm4 = vcmask 785408   ;;  %vm757_vm5 = vcmask 257024  }
  0x1f   : > { %935 = vmatpush3.bf16.msra.mxu0 %v1018_v1  ;;  %936 = vmatprep.mubr.msk.bf16.mxu0 %vm1080_vm1, %v1079_v2  ;;  %v1189_v5 = vld [vmem:[%s329_s17] sm:$0xff]   ;;  %s1211_s6 = ssub.s32 1, %s903_s24  ;;  %s1082_s29 = smov 32  }
  0x20   : > { %941 = vmatpush3.bf16.msra.mxu1 %v1184_v3  ;;  %944 = vmatprep.mubr.msk.bf16.mxu1 %vm1080_vm1, %v1079_v2  ;;  %v907_v7 = vld [vmem:[%s335_s27] ss:$0 sm:$0xff]  ;;  %s910_s11 = sshll.u32 %s1211_s6, 1  ;;  %s676_s13 = smul.u32 3, %s1211_s6 }
  0x21   : > { %942 = vmatprep.subr.bf16.mxu1 %v1079_v2  ;;  %948 = vmatprep.subr.bf16.mxu0 %v1079_v2  ;;  %s1219_s15 = sadd.s32 %s910_s11, %s1214_s10  ;;  %v899_v9 = vld [vmem:[%s332_s14] ss:$0 sm:$0xff]  ;;  %s426_s14 = smul.u32 12, %s1064_s19 }
  0x22   : > { %937 = vmatmul.mubr.msk.bf16.vlgmr.msra.gmra.mxu0 %vm369_vm2, %v1020_v4  ;;  %496 = vrot.lane.b32.xlu0 %v907_v7, %s1081_s23  ;;  %s1222_s16 = sadd.s32 %s676_s13, %s1214_s10  ;;  %s1083_s27 = smov 96  }
  0x23   : > { %v425_v6 = vld [vmem:[#allocation2] sm:$0xf]  ;;  %949 = vmatpush3.bf16.msra.mxu0 %v1184_v3  ;;  %952 = vmatprep.mubr.msk.bf16.mxu0 %vm1080_vm1, %v1079_v2  ;;  %s427_s26 = scalar_lea.vmem [#allocation3], %s426_s14  ;;  %s523_s19 = sadd.s32 %s1211_s6, %s1214_s10 }
  0x24   : > { %v429_v8 = vpack.c.bf16 %v425_v6, %v425_v6  ;;  %943 = vmatpush3.bf16.msra.mxu1 %v1189_v5  ;;  %950 = vmatprep.subr.bf16.mxu0 %v1079_v2  ;;  %s908_s28 = sshll.u32 %s523_s19, 2  ;;  %s911_s7 = sshll.u32 %s1219_s15, 2 }
  0x25   : > { %956 = vmatprep.subr.bf16.mxu1 %v1079_v2  ;;  %s525_s30 = scalar_lea.vmem [#allocation3], %s908_s28  ;;  %s602_s8 = scalar_lea.vmem [#allocation3], %s911_s7 }
  0x26   : > { %s913_s9 = sshll.u32 %s1222_s16, 2  ;;  %p915_p8 = scmp.ne.s32.totalorder %s1060_s18, 1 }
  0x27   : > { %945 = vmatmul.mubr.msk.bf16.vlgmr.msra.gmra.mxu1 %vm442_vm3, %v429_v8  ;;  %951 = vmatpush3.bf16.msra.mxu0 %v1189_v5  ;;  %s679_s24 = scalar_lea.vmem [#allocation3], %s913_s9 }
  0x28   : > { %957 = vmatpush3.bf16.msra.mxu1 %v1184_v3  ;;  %960 = vmatprep.mubr.msk.bf16.mxu1 %vm1080_vm1, %v1079_v2 }
  0x29   : > { %958 = vmatprep.subr.bf16.mxu1 %v1079_v2  ;;  %964 = vmatprep.subr.bf16.mxu0 %v1079_v2 }
  0x2c   : > { %959 = vmatpush3.bf16.msra.mxu1 %v1189_v5 }
  0x94   : > { %v1229_v13 = vpop.permute.xlu0 %496 }
  0xe2   : > { %v407_v10 = vpop.f32.mrf.mxu0 }
  0xe3   : > { %v408_v11 = vadd.f32 %v899_v9, %v407_v10 }
  0xe4   : > { %v938_v12 = vpop.f32.mrf.mxu0 }
  0xe5   : > { %415 = vst.msk [vmem:[#allocation3] sm:$0xff] %vm414_vm4, %v408_v11 }
  0xe6   : > { %v410_v14 = vpop.f32.mrf.mxu0 }
  0xe7   : > { %v411_v15 = vadd.f32 %v899_v9, %v410_v14  ;;  %v480_v16 = vpop.f32.mrf.mxu1 }
  0xe8   : > { %v499_v17 = vadd.f32 %v1229_v13, %v480_v16  ;;  %v939_v18 = vpop.f32.mrf.mxu0 }
  0xe9   : > { %416 = vst.msk [vmem:[#allocation3 + $0x8] sm:$0xff] %vm414_vm4, %v411_v15  ;;  %v946_v19 = vpop.f32.mrf.mxu1 }
  0xea   : > { %501 = vrot.lane.b32.xlu0 %v499_v17, %s1081_s23 }
  0xeb   : > { %v483_v20 = vpop.f32.mrf.mxu1 }
  0xed   : > { %v947_v21 = vpop.f32.mrf.mxu1 }
  0xee   : > { %518 = vrot.lane.b32.xlu0 %v425_v6, %s1082_s29 }
  0xf0   : > { %v428_v22 = vld [vmem:[%s427_s26] sm:$0xf] }
  0xf1   : > { %v486_v23 = vadd.f32 %v480_v16, %v428_v22  ;;  %v526_v46 = vld [vmem:[%s525_s30] sm:$0xf] }
  0xf3   : > { %v487_v24 = vmul.f32 0.5, %v486_v23 }
  0xf5   : > { %1022 = vtanh.f32 %v487_v24 }
 0x102   : > { %v1023_v25 = vpop.eup %1022 }
 0x103   : > { %v489_v26 = vmul.f32 0.5, %v1023_v25 }
 0x105   : > { %v490_v27 = vadd.f32 0.5, %v489_v26 }
 0x107   : > { %v511_v34 = vsub.f32 1.0, %v490_v27 }
 0x15c   : > { %v502_v28 = vpop.permute.xlu0 %501 }
 0x15d   : > { %v504_v29 = vmul.f32 %v502_v28, %v490_v27 }
 0x15f   : > { %506 = vrot.lane.b32.xlu1 %v504_v29, %s1081_s23  ;;  %v680_v29 = vld [vmem:[%s679_s24] sm:$0xf] }
 0x160   : > { %v519_v33 = vpop.permute.xlu0 %518 }
 0x161   : > { %v521_v36 = vmul.f32 %v519_v33, %v490_v27 }
 0x1d1   : > { %v507_v30 = vpop.permute.xlu1 %506 }
 0x1d2   : > { %v509_v31 = vadd.f32 %v507_v30, %v428_v22 }
 0x1d4   : > { %1024 = vtanh.f32 %v509_v31 }
 0x1e1   : > { %v1025_v32 = vpop.eup %1024 }
 0x1e2   : > { %513 = vrot.lane.b32.xlu1 %v1025_v32, %s1083_s27 }
 0x254   : > { %v514_v35 = vpop.permute.xlu1 %513 }
 0x255   : > { %v516_v37 = vmul.f32 %v514_v35, %v511_v34 }
 0x257   : > { %v522_v38 = vadd.f32 %v521_v36, %v516_v37 }
 0x259   : > { %v527_v39 = vpack.c.bf16 %v522_v38, %v522_v38 }
 0x25b   : > { %529 = vrot.lane.b32.xlu1 %v527_v39, %s1083_s27 }
 0x2cd   : > { %v530_v40 = vpop.permute.xlu1 %529 }
 0x2ce   : > { %953 = vmatmul.mubr.msk.bf16.vlgmr.msra.gmra.mxu0 %vm442_vm3, %v530_v40 }
 0x2cf   : > { %965 = vmatpush3.bf16.msra.mxu0 %v1184_v3  ;;  %968 = vmatprep.mubr.msk.bf16.mxu0 %vm1080_vm1, %v1079_v2 }
 0x2d0   : > { %966 = vmatprep.subr.bf16.mxu0 %v1079_v2 }
 0x2d3   : > { %967 = vmatpush3.bf16.msra.mxu0 %v1189_v5  ;;  %v603_v5 = vld [vmem:[%s602_s8] sm:$0xf] }
 0x38e   : > { %v568_v41 = vpop.f32.mrf.mxu0 }
 0x38f   : > { %v579_v42 = vadd.f32 %v568_v41, %v1229_v13  ;;  %v574_v47 = vadd.f32 %v568_v41, %v526_v46 }
 0x390   : > { %v954_v43 = vpop.f32.mrf.mxu0 }
 0x391   : > { %581 = vrot.lane.b32.xlu0 %v579_v42, %s1081_s23  ;;  %v575_v48 = vmul.f32 0.5, %v574_v47 }
 0x392   : > { %v571_v44 = vpop.f32.mrf.mxu0 }
 0x393   : > { %1026 = vtanh.f32 %v575_v48 }
 0x394   : > { %v955_v45 = vpop.f32.mrf.mxu0 }
 0x3a0   : > { %v1027_v49 = vpop.eup %1026 }
 0x3a1   : > { %v577_v50 = vmul.f32 0.5, %v1027_v49 }
 0x3a3   : > { %v578_v51 = vadd.f32 0.5, %v577_v50 }
 0x3a5   : > { %v591_v57 = vsub.f32 1.0, %v578_v51  ;;  %v597_v59 = vmul.f32 %v578_v51, %v522_v38 }
 0x403   : > { %v582_v52 = vpop.permute.xlu0 %581 }
 0x404   : > { %v584_v53 = vmul.f32 %v582_v52, %v578_v51 }
 0x406   : > { %586 = vrot.lane.b32.xlu1 %v584_v53, %s1081_s23 }
 0x478   : > { %v587_v54 = vpop.permute.xlu1 %586 }
 0x479   : > { %v589_v55 = vadd.f32 %v587_v54, %v526_v46 }
 0x47b   : > { %1028 = vtanh.f32 %v589_v55 }
 0x488   : > { %v1029_v56 = vpop.eup %1028 }
 0x489   : > { %593 = vrot.lane.b32.xlu0 %v1029_v56, %s1083_s27 }
 0x4fb   : > { %v594_v58 = vpop.permute.xlu0 %593 }
 0x4fc   : > { %v596_v60 = vmul.f32 %v594_v58, %v591_v57 }
 0x4fe   : > { %v598_v61 = vadd.f32 %v597_v59, %v596_v60 }
 0x500   : > { %v604_v62 = vpack.c.bf16 %v598_v61, %v598_v61 }
 0x502   : > { %606 = vrot.lane.b32.xlu1 %v604_v62, %s1083_s27 }
 0x574   : > { %v607_v63 = vpop.permute.xlu1 %606 }
 0x575   : > { %961 = vmatmul.mubr.msk.bf16.vlgmr.msra.gmra.mxu1 %vm442_vm3, %v607_v63 }
 0x635   : > { %v645_v0 = vpop.f32.mrf.mxu1 }
 0x636   : > { %v656_v1 = vadd.f32 %v645_v0, %v1229_v13  ;;  %v651_v6 = vadd.f32 %v645_v0, %v603_v5 }
 0x637   : > { %v962_v2 = vpop.f32.mrf.mxu1 }
 0x638   : > { %658 = vrot.lane.b32.xlu0 %v656_v1, %s1081_s23  ;;  %v652_v7 = vmul.f32 0.5, %v651_v6 }
 0x639   : > { %v648_v3 = vpop.f32.mrf.mxu1 }
 0x63a   : > { %1030 = vtanh.f32 %v652_v7 }
 0x63b   : > { %v963_v4 = vpop.f32.mrf.mxu1 }
 0x647   : > { %v1031_v8 = vpop.eup %1030 }
 0x648   : > { %v654_v9 = vmul.f32 0.5, %v1031_v8 }
 0x64a   : > { %v655_v10 = vadd.f32 0.5, %v654_v9 }
 0x64c   : > { %v668_v17 = vsub.f32 1.0, %v655_v10  ;;  %v674_v19 = vmul.f32 %v655_v10, %v598_v61 }
 0x6aa   : > { %v659_v11 = vpop.permute.xlu0 %658 }
 0x6ab   : > { %v661_v12 = vmul.f32 %v659_v11, %v655_v10 }
 0x6ad   : > { %663 = vrot.lane.b32.xlu1 %v661_v12, %s1081_s23 }
 0x71f   : > { %v664_v14 = vpop.permute.xlu1 %663 }
 0x720   : > { %v666_v15 = vadd.f32 %v664_v14, %v603_v5 }
 0x722   : > { %1032 = vtanh.f32 %v666_v15 }
 0x72f   : > { %v1033_v16 = vpop.eup %1032 }
 0x730   : > { %670 = vrot.lane.b32.xlu0 %v1033_v16, %s1083_s27 }
 0x7a2   : > { %v671_v18 = vpop.permute.xlu0 %670 }
 0x7a3   : > { %v673_v20 = vmul.f32 %v671_v18, %v668_v17 }
 0x7a5   : > { %v675_v21 = vadd.f32 %v674_v19, %v673_v20 }
 0x7a7   : > { %v681_v22 = vpack.c.bf16 %v675_v21, %v675_v21 }
 0x7a9   : > { %683 = vrot.lane.b32.xlu1 %v681_v22, %s1083_s27 }
 0x81b   : > { %v684_v23 = vpop.permute.xlu1 %683 }
 0x81c   : > { %969 = vmatmul.mubr.msk.bf16.vlgmr.msra.gmra.mxu0 %vm442_vm3, %v684_v23 }
 0x8dc   : > { %v722_v24 = vpop.f32.mrf.mxu0 }
 0x8dd   : > { %v733_v25 = vadd.f32 %v722_v24, %v1229_v13  ;;  %v728_v30 = vadd.f32 %v722_v24, %v680_v29 }
 0x8de   : > { %v970_v26 = vpop.f32.mrf.mxu0 }
 0x8df   : > { %735 = vrot.lane.b32.xlu0 %v733_v25, %s1081_s23  ;;  %v729_v31 = vmul.f32 0.5, %v728_v30 }
 0x8e0   : > { %v725_v27 = vpop.f32.mrf.mxu0 }
 0x8e1   : > { %1034 = vtanh.f32 %v729_v31 }
 0x8e2   : > { %v971_v28 = vpop.f32.mrf.mxu0 }
 0x8ee   : > { %v1035_v32 = vpop.eup %1034 }
 0x8ef   : > { %v731_v33 = vmul.f32 0.5, %v1035_v32 }
 0x8f1   : > { %v732_v34 = vadd.f32 0.5, %v731_v33 }
 0x8f3   : > { %v745_v39 = vsub.f32 1.0, %v732_v34  ;;  %v751_v41 = vmul.f32 %v732_v34, %v675_v21 }
 0x951   : > { %v736_v35 = vpop.permute.xlu0 %735 }
 0x952   : > { %v738_v36 = vmul.f32 %v736_v35, %v732_v34 }
 0x954   : > { %740 = vrot.lane.b32.xlu1 %v738_v36, %s1081_s23 }
 0x9c6   : > { %v741_v37 = vpop.permute.xlu1 %740 }
 0x9c7   : > { %v743_v13 = vadd.f32 %v741_v37, %v680_v29 }
 0x9c9   : > { %1036 = vtanh.f32 %v743_v13 }
 0x9d6   : > { %v1037_v38 = vpop.eup %1036 }
 0x9d7   : > { %747 = vrot.lane.b32.xlu0 %v1037_v38, %s1083_s27 }
 0xa49   : > { %v748_v40 = vpop.permute.xlu0 %747 }
 0xa4a   : > { %v750_v42 = vmul.f32 %v748_v40, %v745_v39 }
 0xa4c   : > { %v752_v43 = vadd.f32 %v751_v41, %v750_v42 }
 0xa4e   : > { %754 = vrot.lane.b32.xlu1 %v752_v43, %s1083_s27 }
 0xabd   : > { %762 = sbr.rel (%p915_p8) target bundleno = 2755 (0xac3), region = 48 }
 0xac0   : > { %v755_v44 = vpop.permute.xlu1 %754 }
 0xac1   : > { %758 = vst.msk [vmem:[#allocation2] sm:$0xf] %vm757_vm5, %v755_v44 }
 0xac2   : > { %763 = vst.msk [vmem:[%s1179_s12] sm:$0xf] %vm757_vm5, %v755_v44 }
 0xac3 PF: > { %s15_s22 = sadd.s32 1, %s1076_s22   ;;  %s1289_s23 = sld [smem:[#allocation4_spill]] }
 0xac4   : > { %p12_p9 = scmp.ge.s32.totalorder %s15_s22, 6   ;;  %s1290_s6 = sld [smem:[#allocation5_spill]] }
 0xac5   : > { %s1291_s18 = smov %s1068_s20  ;;  %s1292_s19 = smov %s1072_s21 }
 0xac6   :  { %14 = sbr.rel (!%p12_p9) target bundleno = 3 (0x3), region = 94 }
 0xac9   : > { %s1293_s20 = smov %s1289_s23 }
 0xaca   : > { %s1294_s21 = smov %s1290_s6 }

</bundles_post_ra>
